<compile_context>
chip_gen: v7x
topology: tpu7x:2x2x1
jax: 0.10.0
libtpu: 0.0.40
codegen_flags: <defaults>
</compile_context>

<pallas_src>
import jax
import jax.numpy as jnp
from jax.experimental import pallas as pl
from jax.experimental.pallas import tpu as pltpu

BN_EPS = 1e-5
LANES = 128


def _round_up(x, m):
    return (x + m - 1) // m * m


# ----------------------------------------------------------------------------
# Fused kernel: the whole Linear->BN->(+res)->(ReLU) stack in one call.
# Grid = (num_layers,); activation lives in VMEM scratch across layers.
# ----------------------------------------------------------------------------
def _fused_transmlp_kernel(flags_ref,           # SMEM (3L,) int32 scalar prefetch
                           x_ref,               # (N, DP) f32, resident input
                           w_ref,               # (1, DP, DP) streamed weight
                           gb_ref,              # (1, 2, DP) f32 gamma/beta
                           o_ref,               # (N, DP) f32 output
                           h_ref,               # VMEM scratch: activation
                           r_ref):              # VMEM scratch: residual
    l = pl.program_id(0)
    last = pl.num_programs(0) - 1

    # Load the (padded) input into the resident activation buffer once.
    @pl.when(l == 0)
    def _():
        h_ref[...] = x_ref[...]

    # ResBlock fc1: snapshot the residual before the matmul.
    @pl.when(flags_ref[3 * l + 0] == 1)
    def _():
        r_ref[...] = h_ref[...]

    w = w_ref[0]                                          # (DP, DP), MXU dtype
    z = jnp.dot(h_ref[...].astype(w.dtype), w,
                preferred_element_type=jnp.float32)       # (N, DP) f32 acc
    # Linear bias omitted: BN(train) mean-subtraction cancels it exactly.

    # BatchNorm1d (training): one-pass per-feature stats over the N rows.
    inv_n = 1.0 / z.shape[0]
    mean = jnp.sum(z, axis=0, keepdims=True) * inv_n
    ex2 = jnp.sum(z * z, axis=0, keepdims=True) * inv_n
    var = jnp.maximum(ex2 - mean * mean, 0.0)
    gb = gb_ref[0]                                        # (2, DP) f32
    y = (z - mean) * jax.lax.rsqrt(var + BN_EPS)
    y = y * gb[0:1, :] + gb[1:2, :]
    h_ref[...] = y

    # ResBlock fc2: add the saved residual.
    @pl.when(flags_ref[3 * l + 1] == 1)
    def _():
        h_ref[...] = h_ref[...] + r_ref[...]

    # ReLU (all layers except the final output layer).
    @pl.when(flags_ref[3 * l + 2] == 1)
    def _():
        h_ref[...] = jnp.maximum(h_ref[...], 0.0)

    # Write the output block only after the last layer.
    @pl.when(l == last)
    def _():
        o_ref[...] = h_ref[...]


def transmlp_forward(packed, x):
    """x: (B, S, input_dim) -> (B, S, output_dim) using the fused kernel."""
    b, s, d = x.shape
    n = b * s
    assert n % 8 == 0, "N = batch*seq must be a multiple of 8 (sublanes)"
    dp = packed["dp"]
    num_layers = packed["n_layers"]

    xf = x.reshape(n, d).astype(jnp.float32)
    x_pad = jnp.zeros((n, dp), jnp.float32).at[:, :d].set(xf)

    out = pl.pallas_call(
        _fused_transmlp_kernel,
        out_shape=jax.ShapeDtypeStruct((n, dp), jnp.float32),
        grid_spec=pltpu.PrefetchScalarGridSpec(
            num_scalar_prefetch=1,
            grid=(num_layers,),
            in_specs=[
                # resident (constant block index -> fetched once)
                pl.BlockSpec((n, dp), lambda l, flags: (0, 0)),
                # per-layer weight tile, auto double-buffered across layers
                pl.BlockSpec((1, dp, dp), lambda l, flags: (l, 0, 0)),
                # per-layer gamma/beta
                pl.BlockSpec((1, 2, dp), lambda l, flags: (l, 0, 0)),
            ],
            out_specs=pl.BlockSpec((n, dp), lambda l, flags: (0, 0)),
            scratch_shapes=[
                pltpu.VMEM((n, dp), jnp.float32),   # activation h
                pltpu.VMEM((n, dp), jnp.float32),   # residual snapshot
            ],
        ),
        compiler_params=pltpu.CompilerParams(
            # the layer axis is a sequential dependency chain
            dimension_semantics=("arbitrary",),
        ),
    )(packed["flags"], x_pad, packed["w"], packed["gb"])

    return out[:, :packed["output_dim"]].reshape(b, s, packed["output_dim"])


# ----------------------------------------------------------------------------
# Parameter construction (mirrors the PyTorch __init__), and packing into the
# stacked, lane-dense layout the fused kernel consumes.
# ----------------------------------------------------------------------------
def _kaiming_linear(key, d_in, d_out):
    kw, kb = jax.random.split(key)
    std = (2.0 / d_in) ** 0.5                      # kaiming_normal_, fan_in
    w = std * jax.random.normal(kw, (d_in, d_out), jnp.float32)
    bound = 1.0 / (d_in ** 0.5)                    # default nn.Linear bias init
    bias = jax.random.uniform(kb, (d_out,), jnp.float32, -bound, bound)
    return w, bias


def _bn_params(dim):
    return jnp.ones((dim,), jnp.float32), jnp.zeros((dim,), jnp.float32)


def init_transmlp_params(key, input_dim, output_dim, num_res_blocks, num_layers):
    hidden = input_dim
    keys = jax.random.split(key, 2 + 2 * num_res_blocks + num_layers)
    ki = iter(range(len(keys)))

    params = {}
    params["input_fc"] = _kaiming_linear(keys[next(ki)], input_dim, hidden)
    params["bn_input"] = _bn_params(hidden)

    params["res_blocks"] = []
    for _ in range(num_res_blocks):
        fc1 = _kaiming_linear(keys[next(ki)], hidden, hidden)
        fc2 = _kaiming_linear(keys[next(ki)], hidden, hidden)
        params["res_blocks"].append({
            "fc1": fc1, "bn1": _bn_params(hidden),
            "fc2": fc2, "bn2": _bn_params(hidden),
        })

    params["extra_layers"] = []
    for _ in range(num_layers):
        fc = _kaiming_linear(keys[next(ki)], hidden, hidden)
        params["extra_layers"].append({"fc": fc, "bn": _bn_params(hidden)})

    params["output_fc"] = _kaiming_linear(keys[next(ki)], hidden, output_dim)
    params["bn_output"] = _bn_params(output_dim)
    return params


def pack_transmlp_params(params, input_dim, output_dim, *,
                         compute_dtype=jnp.float32):
    """Stack all layers into lane-dense arrays for the single fused kernel.

    compute_dtype: MXU input dtype (jnp.bfloat16 on v5e/v6e/v7x for
    throughput; accumulation and BN math stay f32 inside the kernel).
    """
    hidden = input_dim
    dp = _round_up(max(hidden, output_dim), LANES)

    def pad_w(w):
        din, dout = w.shape
        return jnp.zeros((dp, dp), jnp.float32).at[:din, :dout].set(w)

    def pad_gb(g, be):
        gb = jnp.zeros((2, dp), jnp.float32)
        return gb.at[0, :g.shape[0]].set(g).at[1, :be.shape[0]].set(be)

    ws, gbs, flags = [], [], []

    def add_layer(fc, bn, save_res, add_res, relu):
        w, _bias = fc                 # bias folded into the BN mean subtraction
        g, be = bn
        ws.append(pad_w(w))
        gbs.append(pad_gb(g, be))
        flags.extend([save_res, add_res, relu])

    add_layer(params["input_fc"], params["bn_input"], 0, 0, 1)
    for blk in params["res_blocks"]:
        add_layer(blk["fc1"], blk["bn1"], 1, 0, 1)
        add_layer(blk["fc2"], blk["bn2"], 0, 1, 1)
    for lyr in params["extra_layers"]:
        add_layer(lyr["fc"], lyr["bn"], 0, 0, 1)
    add_layer(params["output_fc"], params["bn_output"], 0, 0, 0)

    return {
        "w": jnp.stack(ws).astype(compute_dtype),   # (L, DP, DP)
        "gb": jnp.stack(gbs),                       # (L, 2, DP) f32
        "flags": jnp.asarray(flags, jnp.int32),     # (3L,) -> SMEM prefetch
        "dp": dp,
        "n_layers": len(ws),
        "output_dim": output_dim,
    }
    # TODO(synk): for DP >> 128 or very large N, add a Dout column-tile grid
    # axis (marked "parallel" for v7x's two TensorCores) while keeping all N
    # rows per tile so BN stats stay exact.


# ----------------------------------------------------------------------------
# Pure-JAX reference (faithful to the PyTorch module, incl. Linear bias).
# ----------------------------------------------------------------------------
def _ref_linear_bn(x, w, b, g, be):
    z = jnp.dot(x, w, precision=jax.lax.Precision.HIGHEST) + b
    mean = jnp.mean(z, axis=0, keepdims=True)
    var = jnp.mean((z - mean) ** 2, axis=0, keepdims=True)
    return (z - mean) / jnp.sqrt(var + BN_EPS) * g + be


def transmlp_forward_ref(params, x):
    b, s, d = x.shape
    h = x.reshape(b * s, d).astype(jnp.float32)

    w, bb = params["input_fc"]
    g, be = params["bn_input"]
    h = jnp.maximum(_ref_linear_bn(h, w, bb, g, be), 0.0)

    for blk in params["res_blocks"]:
        residual = h
        w1, b1 = blk["fc1"]; g1, be1 = blk["bn1"]
        out = jnp.maximum(_ref_linear_bn(h, w1, b1, g1, be1), 0.0)
        w2, b2 = blk["fc2"]; g2, be2 = blk["bn2"]
        h = jnp.maximum(_ref_linear_bn(out, w2, b2, g2, be2) + residual, 0.0)

    for lyr in params["extra_layers"]:
        w, bb = lyr["fc"]; g, be = lyr["bn"]
        h = jnp.maximum(_ref_linear_bn(h, w, bb, g, be), 0.0)

    w, bb = params["output_fc"]; g, be = params["bn_output"]
    h = _ref_linear_bn(h, w, bb, g, be)
    return h.reshape(b, s, -1)


if __name__ == "__main__":
    B, S = 2, 8                  # batch, seq_len -> N = 16 rows
    INPUT_DIM = 32               # hidden_dim == input_dim in the module
    OUTPUT_DIM = 16
    NUM_RES_BLOCKS = 2
    NUM_LAYERS = 3               # extra layers (module default is 10; kept small)

    key = jax.random.PRNGKey(0)
    kp, kx = jax.random.split(key)
    params = init_transmlp_params(kp, INPUT_DIM, OUTPUT_DIM,
                                  NUM_RES_BLOCKS, NUM_LAYERS)
    x = jax.random.normal(kx, (B, S, INPUT_DIM), jnp.float32)

    ref = transmlp_forward_ref(params, x)

    # f32 MXU path — checked tight against the PyTorch-faithful reference.
    packed_f32 = pack_transmlp_params(params, INPUT_DIM, OUTPUT_DIM,
                                      compute_dtype=jnp.float32)
    out = jax.block_until_ready(transmlp_forward(packed_f32, x))
    assert out.shape == (B, S, OUTPUT_DIM), out.shape
    max_err = float(jnp.max(jnp.abs(out - ref)))
    assert max_err < 2e-4, f"max abs err vs reference: {max_err}"

    # bf16 MXU path (throughput mode on v5e/v6e/v7x): f32 accumulation, BN in
    # f32. Exercised for compile/run health; looser numerical expectations.
    packed_bf16 = pack_transmlp_params(params, INPUT_DIM, OUTPUT_DIM,
                                       compute_dtype=jnp.bfloat16)
    out_bf16 = jax.block_until_ready(transmlp_forward(packed_bf16, x))
    assert out_bf16.shape == (B, S, OUTPUT_DIM)
    assert bool(jnp.all(jnp.isfinite(out_bf16)))

    print("KERNEL_OK")
</pallas_src>

<mosaic_0001>
module attributes {stable_mosaic.version = 11 : i64} {
  func.func @_fused_transmlp_kernel(%arg0: i32, %arg1: memref<27xi32, #tpu.memory_space<smem>>, %arg2: memref<16x128xf32, #tpu.memory_space<vmem>>, %arg3: memref<1x128x128xf32, #tpu.memory_space<vmem>>, %arg4: memref<1x2x128xf32, #tpu.memory_space<vmem>>, %arg5: memref<16x128xf32, #tpu.memory_space<vmem>>, %arg6: memref<16x128xf32, #tpu.memory_space<vmem>>, %arg7: memref<16x128xf32, #tpu.memory_space<vmem>>) attributes {dimension_semantics = [#tpu.dimension_semantics<arbitrary>], iteration_bounds = array<i64: 9>, scalar_prefetch = 1 : i64, scratch_operands = 2 : i64, tpu.core_type = #tpu.core_type<tc>, window_params = [{pipeline_mode = #tpu.pipeline_mode<synchronous>, transform_indices = @transform_0, window_bounds = array<i64: 16, 128>}, {transform_indices = @transform_1, window_bounds = array<i64: 1, 128, 128>}, {transform_indices = @transform_2, window_bounds = array<i64: 1, 2, 128>}, {pipeline_mode = #tpu.pipeline_mode<synchronous>, transform_indices = @transform_3, window_bounds = array<i64: 16, 128>}]} {
    %c0_i32 = arith.constant 0 : i32
    %0 = arith.cmpi eq, %arg0, %c0_i32 : i32
    %1 = arith.extui %0 : i1 to i32
    %c0_i32_0 = arith.constant 0 : i32
    %2 = arith.cmpi ne, %1, %c0_i32_0 : i32
    scf.if %2 {
      %c0_26 = arith.constant 0 : index
      %c0_27 = arith.constant 0 : index
      %60 = vector.load %arg2[%c0_26, %c0_27] : memref<16x128xf32, #tpu.memory_space<vmem>>, vector<16x128xf32>
      %c0_28 = arith.constant 0 : index
      %c0_29 = arith.constant 0 : index
      %61 = vector.load %arg6[%c0_28, %c0_29] : memref<16x128xf32, #tpu.memory_space<vmem>>, vector<16x128xf32>
      tpu.vector_store %arg6[%c0_28, %c0_29], %60 {strides = array<i32>} : memref<16x128xf32, #tpu.memory_space<vmem>>, vector<16x128xf32>,
    } else {
    }
    %c3_i32 = arith.constant 3 : i32
    %3 = arith.muli %c3_i32, %arg0 : i32
    %c0_i32_1 = arith.constant 0 : i32
    %4 = arith.addi %3, %c0_i32_1 : i32
    %5 = arith.index_cast %4 : i32 to index
    %6 = memref.load %arg1[%5] : memref<27xi32, #tpu.memory_space<smem>>
    %c1_i32 = arith.constant 1 : i32
    %7 = arith.cmpi eq, %6, %c1_i32 : i32
    %8 = arith.extui %7 : i1 to i32
    %c0_i32_2 = arith.constant 0 : i32
    %9 = arith.cmpi ne, %8, %c0_i32_2 : i32
    scf.if %9 {
      %c0_26 = arith.constant 0 : index
      %c0_27 = arith.constant 0 : index
      %60 = vector.load %arg6[%c0_26, %c0_27] : memref<16x128xf32, #tpu.memory_space<vmem>>, vector<16x128xf32>
      %c0_28 = arith.constant 0 : index
      %c0_29 = arith.constant 0 : index
      %61 = vector.load %arg7[%c0_28, %c0_29] : memref<16x128xf32, #tpu.memory_space<vmem>>, vector<16x128xf32>
      tpu.vector_store %arg7[%c0_28, %c0_29], %60 {strides = array<i32>} : memref<16x128xf32, #tpu.memory_space<vmem>>, vector<16x128xf32>,
    } else {
    }
    %c0 = arith.constant 0 : index
    %c0_3 = arith.constant 0 : index
    %c0_4 = arith.constant 0 : index
    %10 = vector.load %arg3[%c0, %c0_3, %c0_4] : memref<1x128x128xf32, #tpu.memory_space<vmem>>, vector<1x128x128xf32>
    %11 = vector.shape_cast %10 : vector<1x128x128xf32> to vector<128x128xf32>
    %c0_5 = arith.constant 0 : index
    %c0_6 = arith.constant 0 : index
    %12 = vector.load %arg6[%c0_5, %c0_6] : memref<16x128xf32, #tpu.memory_space<vmem>>, vector<16x128xf32>
    %cst = arith.constant dense<0.000000e+00> : vector<16x128xf32>
    %13 = tpu.matmul %12, %11, %cst {dimension_numbers = #tpu.dot_dimension_numbers<[1], [0], [0], [1], [0, 0, 1, 1], [], []>} : vector<16x128xf32>, vector<128x128xf32>, vector<16x128xf32> -> vector<16x128xf32>
    %cst_7 = arith.constant dense<0.000000e+00> : vector<128xf32>
    %14 = vector.multi_reduction <add>, %13, %cst_7 [0] : vector<16x128xf32> to vector<128xf32>
    %15 = vector.shape_cast %14 : vector<128xf32> to vector<1x128xf32>
    %cst_8 = arith.constant 6.250000e-02 : f32
    %16 = vector.broadcast %cst_8 : f32 to vector<1x128xf32>
    %17 = arith.mulf %15, %16 : vector<1x128xf32>
    %18 = arith.mulf %13, %13 : vector<16x128xf32>
    %cst_9 = arith.constant dense<0.000000e+00> : vector<128xf32>
    %19 = vector.multi_reduction <add>, %18, %cst_9 [0] : vector<16x128xf32> to vector<128xf32>
    %20 = vector.shape_cast %19 : vector<128xf32> to vector<1x128xf32>
    %cst_10 = arith.constant 6.250000e-02 : f32
    %21 = vector.broadcast %cst_10 : f32 to vector<1x128xf32>
    %22 = arith.mulf %20, %21 : vector<1x128xf32>
    %23 = arith.mulf %17, %17 : vector<1x128xf32>
    %24 = arith.subf %22, %23 : vector<1x128xf32>
    %cst_11 = arith.constant 0.000000e+00 : f32
    %25 = vector.broadcast %cst_11 : f32 to vector<1x128xf32>
    %26 = arith.maximumf %24, %25 : vector<1x128xf32>
    %c0_12 = arith.constant 0 : index
    %c0_13 = arith.constant 0 : index
    %c0_14 = arith.constant 0 : index
    %27 = vector.load %arg4[%c0_12, %c0_13, %c0_14] : memref<1x2x128xf32, #tpu.memory_space<vmem>>, vector<1x2x128xf32>
    %28 = vector.shape_cast %27 : vector<1x2x128xf32> to vector<2x128xf32>
    %29 = vector.broadcast %17 : vector<1x128xf32> to vector<16x128xf32>
    %30 = arith.subf %13, %29 : vector<16x128xf32>
    %cst_15 = arith.constant 9.99999974E-6 : f32
    %31 = vector.broadcast %cst_15 : f32 to vector<1x128xf32>
    %32 = arith.addf %26, %31 : vector<1x128xf32>
    %33 = math.rsqrt %32 : vector<1x128xf32>
    %34 = vector.broadcast %33 : vector<1x128xf32> to vector<16x128xf32>
    %35 = arith.mulf %30, %34 : vector<16x128xf32>
    %36 = vector.extract_strided_slice %28 {offsets = [0, 0], sizes = [1, 128], strides = [1, 1]} : vector<2x128xf32> to vector<1x128xf32>
    %37 = vector.broadcast %36 : vector<1x128xf32> to vector<16x128xf32>
    %38 = arith.mulf %35, %37 : vector<16x128xf32>
    %39 = vector.extract_strided_slice %28 {offsets = [1, 0], sizes = [1, 128], strides = [1, 1]} : vector<2x128xf32> to vector<1x128xf32>
    %40 = vector.broadcast %39 : vector<1x128xf32> to vector<16x128xf32>
    %41 = arith.addf %38, %40 : vector<16x128xf32>
    %c0_16 = arith.constant 0 : index
    %c0_17 = arith.constant 0 : index
    %42 = vector.load %arg6[%c0_16, %c0_17] : memref<16x128xf32, #tpu.memory_space<vmem>>, vector<16x128xf32>
    tpu.vector_store %arg6[%c0_16, %c0_17], %41 {strides = array<i32>} : memref<16x128xf32, #tpu.memory_space<vmem>>, vector<16x128xf32>,
    %c3_i32_18 = arith.constant 3 : i32
    %43 = arith.muli %c3_i32_18, %arg0 : i32
    %c1_i32_19 = arith.constant 1 : i32
    %44 = arith.addi %43, %c1_i32_19 : i32
    %45 = arith.index_cast %44 : i32 to index
    %46 = memref.load %arg1[%45] : memref<27xi32, #tpu.memory_space<smem>>
    %c1_i32_20 = arith.constant 1 : i32
    %47 = arith.cmpi eq, %46, %c1_i32_20 : i32
    %48 = arith.extui %47 : i1 to i32
    %c0_i32_21 = arith.constant 0 : i32
    %49 = arith.cmpi ne, %48, %c0_i32_21 : i32
    scf.if %49 {
      %c0_26 = arith.constant 0 : index
      %c0_27 = arith.constant 0 : index
      %60 = vector.load %arg6[%c0_26, %c0_27] : memref<16x128xf32, #tpu.memory_space<vmem>>, vector<16x128xf32>
      %c0_28 = arith.constant 0 : index
      %c0_29 = arith.constant 0 : index
      %61 = vector.load %arg7[%c0_28, %c0_29] : memref<16x128xf32, #tpu.memory_space<vmem>>, vector<16x128xf32>
      %62 = arith.addf %60, %61 : vector<16x128xf32>
      %c0_30 = arith.constant 0 : index
      %c0_31 = arith.constant 0 : index
      %63 = vector.load %arg6[%c0_30, %c0_31] : memref<16x128xf32, #tpu.memory_space<vmem>>, vector<16x128xf32>
      tpu.vector_store %arg6[%c0_30, %c0_31], %62 {strides = array<i32>} : memref<16x128xf32, #tpu.memory_space<vmem>>, vector<16x128xf32>,
    } else {
    }
    %c3_i32_22 = arith.constant 3 : i32
    %50 = arith.muli %c3_i32_22, %arg0 : i32
    %c2_i32 = arith.constant 2 : i32
    %51 = arith.addi %50, %c2_i32 : i32
    %52 = arith.index_cast %51 : i32 to index
    %53 = memref.load %arg1[%52] : memref<27xi32, #tpu.memory_space<smem>>
    %c1_i32_23 = arith.constant 1 : i32
    %54 = arith.cmpi eq, %53, %c1_i32_23 : i32
    %55 = arith.extui %54 : i1 to i32
    %c0_i32_24 = arith.constant 0 : i32
    %56 = arith.cmpi ne, %55, %c0_i32_24 : i32
    scf.if %56 {
      %c0_26 = arith.constant 0 : index
      %c0_27 = arith.constant 0 : index
      %60 = vector.load %arg6[%c0_26, %c0_27] : memref<16x128xf32, #tpu.memory_space<vmem>>, vector<16x128xf32>
      %cst_28 = arith.constant 0.000000e+00 : f32
      %61 = vector.broadcast %cst_28 : f32 to vector<16x128xf32>
      %62 = arith.maximumf %60, %61 : vector<16x128xf32>
      %c0_29 = arith.constant 0 : index
      %c0_30 = arith.constant 0 : index
      %63 = vector.load %arg6[%c0_29, %c0_30] : memref<16x128xf32, #tpu.memory_space<vmem>>, vector<16x128xf32>
      tpu.vector_store %arg6[%c0_29, %c0_30], %62 {strides = array<i32>} : memref<16x128xf32, #tpu.memory_space<vmem>>, vector<16x128xf32>,
    } else {
    }
    %c8_i32 = arith.constant 8 : i32
    %57 = arith.cmpi eq, %arg0, %c8_i32 : i32
    %58 = arith.extui %57 : i1 to i32
    %c0_i32_25 = arith.constant 0 : i32
    %59 = arith.cmpi ne, %58, %c0_i32_25 : i32
    scf.if %59 {
      %c0_26 = arith.constant 0 : index
      %c0_27 = arith.constant 0 : index
      %60 = vector.load %arg6[%c0_26, %c0_27] : memref<16x128xf32, #tpu.memory_space<vmem>>, vector<16x128xf32>
      %c0_28 = arith.constant 0 : index
      %c0_29 = arith.constant 0 : index
      %61 = vector.load %arg5[%c0_28, %c0_29] : memref<16x128xf32, #tpu.memory_space<vmem>>, vector<16x128xf32>
      tpu.vector_store %arg5[%c0_28, %c0_29], %60 {strides = array<i32>} : memref<16x128xf32, #tpu.memory_space<vmem>>, vector<16x128xf32>,
    } else {
    }
    return
  }
  func.func @transform_0(%arg0: i32, %arg1: memref<27xi32, #tpu.memory_space<smem>>) -> (i32, i32) {
    %c0_i32 = arith.constant 0 : i32
    %c0_i32_0 = arith.constant 0 : i32
    %c0_i32_1 = arith.constant 0 : i32
    return %c0_i32, %c0_i32_0 : i32, i32
  }
  func.func @transform_1(%arg0: i32, %arg1: memref<27xi32, #tpu.memory_space<smem>>) -> (i32, i32, i32) {
    %c0_i32 = arith.constant 0 : i32
    %c0_i32_0 = arith.constant 0 : i32
    %c0_i32_1 = arith.constant 0 : i32
    return %arg0, %c0_i32, %c0_i32_0 : i32, i32, i32
  }
  func.func @transform_2(%arg0: i32, %arg1: memref<27xi32, #tpu.memory_space<smem>>) -> (i32, i32, i32) {
    %c0_i32 = arith.constant 0 : i32
    %c0_i32_0 = arith.constant 0 : i32
    %c0_i32_1 = arith.constant 0 : i32
    return %arg0, %c0_i32, %c0_i32_0 : i32, i32, i32
  }
  func.func @transform_3(%arg0: i32, %arg1: memref<27xi32, #tpu.memory_space<smem>>) -> (i32, i32) {
    %c0_i32 = arith.constant 0 : i32
    %c0_i32_0 = arith.constant 0 : i32
    %c0_i32_1 = arith.constant 0 : i32
    return %c0_i32, %c0_i32_0 : i32, i32
  }
}

</mosaic_0001>

<bundles_post_ra>
// kernel: tpu_custom_call.1
= control target key start
LH: loop header
LB: loop body
LE: loop exit
PB: predicated region body
PF: predicated region fallthrough
CT: control target
= control target key end

     0   :  { %s1145_s0 = inlined_call_operand.hbm [shape: s32[27], index: 0, kind: input, shape index: {}]   ;;  %s1146_s1 = inlined_call_operand.hbm [shape: f32[16,128], index: 1, kind: input, shape index: {}]   ;;  %s1147_s2 = inlined_call_operand.hbm [shape: f32[9,128,128], index: 2, kind: input, shape index: {}]   ;;  %s1148_s3 = inlined_call_operand.hbm [shape: f32[9,2,128], index: 3, kind: input, shape index: {}]   ;;  %s1149_s4 = inlined_call_operand.hbm [shape: f32[16,128], index: 4, kind: output, shape index: {}]  }
   0x1   :  { %s686_s17 = scalar_lea.hbm %s1145_s0, 16 }
   0x2   :  { %p687_p0 = scmp.ne.s32.totalorder %s1145_s0, %s686_s17  ;;  %p690_p1 = scmp.lt.u32.totalorder %s686_s17, %s1145_s0 }
   0x4   :  { %p692_p2 = pnand %p690_p1, %p687_p0 }
   0x6   :  { %695 = shalt.err (!%p692_p2)  }
   0x7   :  { %s856_s22 = smov [#allocation5]  }
   0x8   :  { %10 = dma.hbm_to_smem %s1145_s0, 16, %s856_s22, [#allocation4] }
   0x9   :  { %826 = dma.done.wait [#allocation4], 16 }
   0xa   :  { %827 = vsyncadd [#allocation4], 4294967280 }
   0xb   :  { %12 = sfence }
   0xc   :  { %13 = vsyncpa [#allocation7], 0 }
   0xd   :  { %14 = vsyncpa [#allocation10], 0 }
   0xe   :  { %16 = vsyncpa [#allocation10 + $0x1], 0 }
   0xf   :  { %17 = vsyncpa [#allocation8], 0  ;;  %s902_s25 = smov 0   ;;  %s904_s26 = smov 0  }
  0x10   :  { %s906_s27 = smov 0   ;;  %s908_s28 = smov 0  }
  0x11 LB: > { %s923_s0 = sadd.s32 1, %s854_s28   ;;  %s51_s29 = sadd.s32 1, %s850_s27  ;;  %s854_s28 = sphi %s908_s28, %s1171_s28   ;;  %s850_s27 = sphi %s906_s27, %s1170_s27   ;;  %s846_s26 = sphi %s904_s26, %s1169_s26   ;;  %s842_s25 = sphi %s902_s25, %s1168_s25  }
  0x12   : > { %s48_s30 = ssub.s32 %s854_s28, %s923_s0  ;;  %p58_p3 = scmp.ne.s32.totalorder %s850_s27, %s846_s26 }
  0x13   : > { %p49_p4 = scmp.eq.s32.totalorder %s48_s30, 0  ;;  %p59_p5 = scmp.eq.s32.totalorder %s854_s28, 0 }
  0x14   : > { %p641_p7 = scmp.lt.s32.totalorder %s854_s28, 9  ;;  %s148_s6 = sand.u32 1, %s854_s28  }
  0x15   : > { %s932_s5 = scalar_select %p49_p4, %s850_s27, %s51_s29  }
  0x16   : > { %p60_p6 = por %p59_p5, %p58_p3  ;;  %s150_s7 = sand.u32 1, %s850_s27  }
  0x17   : > { %s513_s8 = sshll.u32 %s150_s7, 7  ;;  %s531_s9 = sshll.u32 %s854_s28, 11 }
  0x18   : > { %s943_s12 = scalar_lea.hbm %s1147_s2, %s531_s9  ;;  %s152_s13 = scalar_lea.vmem [#allocation9], %s513_s8 }
  0x19   : > { %s159_s14 = sshll.u32 %s152_s13, 4  ;;  %p945_p8 = pnand %p641_p7, %p60_p6  ;;  %s949_s14 = int_to_ptr.vmem [resolvable:$true] %s159_s14 }
  0x1a   : > { %s951_s16 = scalar_lea.sflag [#allocation10], %s148_s6  ;;  %s696_s17 = scalar_lea.hbm %s943_s12, 2048 }
  0x1b   : > { %s1156_s15 = scalar_select %p945_p8, 1, 0 }
  0x1c   : > { %p697_p9 = scmp.ne.s32.totalorder %s943_s12, %s696_s17  ;;  %p1151_p10 = pneg %p945_p8 }
  0x1d   : > { %s701_s20 = scalar_lea.hbm %s1147_s2, 18432  ;;  %p702_p13 = scmp.lt.u32.totalorder %s943_s12, %s1147_s2 }
  0x1e   : > { %p699_p11 = pnand %p1151_p10, %p697_p9  ;;  %p703_p0 = scmp.lt.u32.totalorder %s701_s20, %s696_s17 }
  0x1f   : > { %p705_p2 = scmp.lt.u32.totalorder %s696_s17, %s943_s12 }
  0x20   : > { %p700_p12 = pneg %p699_p11  ;;  %p704_p1 = por %p703_p0, %p702_p13 }
  0x22   : > { %p706_p3 = por %p705_p2, %p704_p1 }
  0x24   : > { %p707_p4 = pnand %p706_p3, %p700_p12 }
  0x26   : > { %710 = shalt.err (!%p707_p4)
}
  0x27   : > { %s711_s23 = scalar_lea.vmem %s949_s14, 2048  ;;  %s857_s24 = smov [#allocation9]  }
  0x28   : > { %p712_p5 = scmp.ne.s32.totalorder %s949_s14, %s711_s23  ;;  %s716_s29 = sshll.u32 %s857_s24, 4  ;;  %s717_s29 = int_to_ptr.vmem [resolvable:$false] %s716_s29 }
  0x29   : > { %s718_s30 = scalar_lea.vmem %s717_s29, 4096  ;;  %p719_p9 = scmp.lt.s32.totalorder %s949_s14, %s717_s29 }
  0x2a   : > { %p714_p6 = pnand %p712_p5, %p1151_p10  ;;  %p720_p11 = scmp.lt.s32.totalorder %s718_s30, %s711_s23 }
  0x2c   : > { %p715_p7 = pneg %p714_p6  ;;  %p721_p13 = por %p720_p11, %p719_p9 }
  0x2e   : > { %p722_p0 = pnand %p721_p13, %p715_p7 }
  0x30   : > { %725 = shalt.err (!%p722_p0)
}
  0x31   : > { %s858_s6 = smov 128   ;;  %s859_s8 = smov 8  }
  0x32   : > { %636 = dma.hbm_to_vmem [thread:$0]  (!%p945_p8), %s943_s12, 2048, %s949_s14, %s951_s16, %s858_s6, %s858_s6, %s859_s8  }
  0x33   : > { %s983_s9 = sadd.s32 4294967295, %s854_s28   ;;  %p64_p12 = scmp.ne.s32.totalorder %s846_s26, %s842_s25 }
  0x34   : > { %p1150_p1 = scmp.eq.s32.totalorder %s983_s9, 0  ;;  %p510_p2 = scmp.ge.s32.totalorder %s854_s28, 1 }
  0x35   : > { %p122_p3 = scmp.lt.s32.totalorder %s854_s28, 10  ;;  %s860_s12 = smov [#allocation6]  }
  0x36   : > { %p993_p5 = por %p1150_p1, %p64_p12  ;;  %s134_s13 = sshll.u32 %s860_s12, 4  ;;  %s135_s13 = int_to_ptr.vmem [resolvable:$true] %s134_s13 }
  0x37   : > { %p997_p6 = pnand %p510_p2, %p122_p3  ;;  %s516_s14 = sshll.u32 %s150_s7, 1 }
  0x38   : > { %s1157_s10 = scalar_select %p993_p5, 1, 0 }
  0x39   : > { %s1158_s11 = scalar_select %p997_p6, 1, 0 }
  0x3a   : > { %p629_p7 = pneg %p997_p6  ;;  %s517_s25 = sshll.u32 %s854_s28, 5 }
  0x3b   : > { %s173_s17 = scalar_lea.vmem [#allocation11], %s516_s14  ;;  %s1015_s22 = scalar_lea.hbm %s1148_s3, %s517_s25 }
  0x3c   : > { %s180_s18 = sshll.u32 %s173_s17, 4  ;;  %p1008_p9 = pnand %p629_p7, %p1150_p1  ;;  %s1017_s18 = int_to_ptr.vmem [resolvable:$true] %s180_s18 }
  0x3d   : > { %s726_s28 = scalar_lea.hbm %s1146_s1, 256 }
  0x3e   : > { %p727_p11 = scmp.ne.s32.totalorder %s1146_s1, %s726_s28  ;;  %p728_p13 = pneg %p1008_p9 }
  0x3f   : > { %p733_p2 = scmp.lt.u32.totalorder %s726_s28, %s1146_s1 }
  0x40   : > { %p729_p0 = pnand %p728_p13, %p727_p11 }
  0x42   : > { %p730_p12 = pneg %p729_p0 }
  0x44   : > { %p735_p3 = pnand %p733_p2, %p730_p12 }
  0x46   : > { %738 = shalt.err (!%p735_p3)
}
  0x47   : > { %s739_s14 = scalar_lea.vmem %s135_s13, 256  ;;  %p747_p10 = scmp.lt.s32.totalorder %s135_s13, %s135_s13 }
  0x48   : > { %p740_p7 = scmp.ne.s32.totalorder %s135_s13, %s739_s14  ;;  %p748_p5 = scmp.lt.s32.totalorder %s739_s14, %s739_s14 }
  0x4a   : > { %p742_p4 = pnand %p740_p7, %p728_p13  ;;  %p749_p6 = por %p748_p5, %p747_p10 }
  0x4c   : > { %p743_p1 = pneg %p742_p4 }
  0x4e   : > { %p750_p8 = pnand %p749_p6, %p743_p1 }
  0x50   : > { %753 = shalt.err (!%p750_p8)
}
  0x51   : > { %632 = dma.hbm_to_vmem [thread:$0]  (!%p1008_p9), %s1146_s1, 256, %s135_s13, [#allocation7], %s858_s6, %s858_s6, %s859_s8  }
  0x52   : > { %s754_s20 = scalar_lea.hbm %s1015_s22, 32  ;;  %p1160_p11 = scmp.ne.s32.totalorder %s1156_s15, 0 }
  0x53   : > { %p755_p4 = scmp.ne.s32.totalorder %s1015_s22, %s754_s20  ;;  %s759_s7 = scalar_lea.hbm %s1148_s3, 288 }
  0x54   : > { %p1161_p10 = pneg %p1160_p11  ;;  %p760_p5 = scmp.lt.u32.totalorder %s1015_s22, %s1148_s3 }
  0x55   : > { %p761_p6 = scmp.lt.u32.totalorder %s759_s7, %s754_s20  ;;  %p763_p0 = scmp.lt.u32.totalorder %s754_s20, %s1015_s22 }
  0x56   : > { %p757_p1 = pnand %p755_p4, %p1161_p10 }
  0x57   : > { %p762_p13 = por %p761_p6, %p760_p5 }
  0x58   : > { %p758_p8 = pneg %p757_p1 }
  0x59   : > { %p764_p12 = por %p763_p0, %p762_p13 }
  0x5b   : > { %p765_p2 = pnand %p764_p12, %p758_p8 }
  0x5d   : > { %768 = shalt.err (!%p765_p2)
}
  0x5e   : > { %s769_s6 = scalar_lea.vmem %s1017_s18, 32  ;;  %p1162_p3 = pmov %p1161_p10 }
  0x5f   : > { %p770_p9 = scmp.ne.s32.totalorder %s1017_s18, %s769_s6  ;;  %s861_s8 = smov [#allocation11]  }
  0x60   : > { %s774_s13 = sshll.u32 %s861_s8, 4  ;;  %s775_s13 = int_to_ptr.vmem [resolvable:$false] %s774_s13 }
  0x61   : > { %p772_p7 = pnand %p770_p9, %p1162_p3  ;;  %s776_s24 = scalar_lea.vmem %s775_s13, 64 }
  0x62   : > { %p777_p10 = scmp.lt.s32.totalorder %s1017_s18, %s775_s13  ;;  %p778_p1 = scmp.lt.s32.totalorder %s776_s24, %s769_s6 }
  0x63   : > { %p773_p4 = pneg %p772_p7 }
  0x64   : > { %p779_p5 = por %p778_p1, %p777_p10 }
  0x66   : > { %p780_p6 = pnand %p779_p5, %p773_p4 }
  0x68   : > { %783 = shalt.err (!%p780_p6)
}
  0x69   : > { %639 = dma.hbm_to_vmem [thread:$0]  (!%p1160_p11), %s1015_s22, 32, %s1017_s18, %s951_s16  }
  0x6a   : > { %p1163_p8 = scmp.ne.s32.totalorder %s1158_s11, 0 }
  0x6b   : > { %p1164_p13 = scmp.eq.s32.totalorder (!%p1163_p8), %s983_s9, 0 }
  0x6c   : > { %189 = sbr.rel (%p1163_p8) target bundleno = 498 (0x1f2), region = 32 }
  0x73   : > { %829 = dma.done.wait (%p1164_p13), [#allocation7], 256   ;;  %p1165_p0 = pmov %p1164_p13 }
  0x74   : > { %s195_s29 = sand.u32 1, %s983_s9   ;;  %s197_s30 = sand.u32 1, %s846_s26  }
  0x75   : > { %831 = vsyncadd (%p1165_p0), [#allocation7], 4294967040  ;;  %s520_s12 = sshll.u32 %s197_s30, 7  ;;  %s196_s15 = scalar_lea.sflag [#allocation10], %s195_s29 }
  0x76   : > { %s1070_s14 = scalar_lea.vmem [#allocation9], %s520_s12  ;;  %p1166_p12 = scmp.ne.s32.totalorder %s1157_s10, 0 }
  0x78   : > { %833 = dma.done.wait (%p1166_p12), %s196_s15, 2080  }
  0x79   : > { %835 = vsyncadd (%p1166_p12), %s196_s15, 4294965216  ;;  %s1076_s16 = sshll.u32 %s197_s30, 1  ;;  %p1167_p11 = scmp.ne.s32.totalorder %s983_s9, 0 }
  0x7a   : > { %s208_s11 = scalar_lea.vmem [#allocation11], %s1076_s16  ;;  %v235_v0 = vld [vmem:[#allocation6] sm:$0xff] (!%p1167_p11)  ;;  %v236_v1 = vld [vmem:[#allocation6 + $0x8] sm:$0xff] (!%p1167_p11) }
  0x7b   : > { %234 = sbr.rel (%p1167_p11) target bundleno = 130 (0x82), region = 48  ;;  %237 = vst [vmem:[#allocation2] sm:$0xff] (!%p1167_p11), %v235_v0  ;;  %238 = vst [vmem:[#allocation2 + $0x8] sm:$0xff] (!%p1167_p11), %v236_v1 }
  0x82 PF: > { %s1082_s18 = smul.u32 3, %s983_s9 }
  0x84   : > { %s240_s22 = sld [smem:[#allocation5 + %s1082_s18]] }
  0x8a   : > { %p523_p2 = scmp.ne.s32.totalorder %s240_s22, 1 }
  0x8b   : > { %v245_v2 = vld [vmem:[#allocation2] sm:$0xff] (!%p523_p2)  ;;  %v246_v3 = vld [vmem:[#allocation2 + $0x8] sm:$0xff] (!%p523_p2) }
  0x8c   : > { %244 = sbr.rel (%p523_p2) target bundleno = 147 (0x93), region = 52  ;;  %247 = vst [vmem:[#allocation3] sm:$0xff] (!%p523_p2), %v245_v2  ;;  %248 = vst [vmem:[#allocation3 + $0x8] sm:$0xff] (!%p523_p2), %v246_v3 }
  0x93 PF: > { %v249_v4 = vld [vmem:[%s1070_s14] sm:$0xff]  ;;  %v250_v5 = vld [vmem:[%s1070_s14 + $0x8] sm:$0xff]  ;;  %v251_v6 = vld [vmem:[%s1070_s14 + $0x10] sm:$0xff]  ;;  %s384_s10 = sadd.s32 1, %s1082_s18  ;;  %v370_v55 = vlaneseq }
  0x94   : > { %v585_v7 = vpack.c.bf16 %v250_v5, %v249_v4  ;;  %v252_v8 = vld [vmem:[%s1070_s14 + $0x18] sm:$0xff]  ;;  %v253_v10 = vld [vmem:[%s1070_s14 + $0x20] sm:$0xff]  ;;  %v254_v11 = vld [vmem:[%s1070_s14 + $0x28] sm:$0xff]  ;;  %s1102_s25 = sld [smem:[#allocation5 + %s384_s10]] }
  0x95   : > { %v589_v9 = vpack.c.bf16 %v252_v8, %v251_v6  ;;  %v593_v12 = vpack.c.bf16 %v254_v11, %v253_v10  ;;  %v265_v13 = vld [vmem:[#allocation2] sm:$0xff]  ;;  %v256_v15 = vld [vmem:[%s1070_s14 + $0x38] sm:$0xff]  ;;  %v257_v17 = vld [vmem:[%s1070_s14 + $0x40] sm:$0xff]  ;;  %v371_v57 = vshrl.u32 %v370_v55, 7 }
  0x96   : > { %586 = vmatprep.subr.bf16.mxu0 %v585_v7  ;;  %v255_v14 = vld [vmem:[%s1070_s14 + $0x30] sm:$0xff]  ;;  %582 = vmatprep.mubr.f32.mxu0 %v265_v13  ;;  %v258_v18 = vld [vmem:[%s1070_s14 + $0x48] sm:$0xff]  ;;  %v260_v21 = vld [vmem:[%s1070_s14 + $0x58] sm:$0xff] }
  0x97   : > { %588 = vmatpush3.bf16.msra.mxu0 %v585_v7  ;;  %v597_v16 = vpack.c.bf16 %v256_v15, %v255_v14  ;;  %v601_v19 = vpack.c.bf16 %v258_v18, %v257_v17  ;;  %v259_v20 = vld [vmem:[%s1070_s14 + $0x50] sm:$0xff]  ;;  %v261_v23 = vld [vmem:[%s1070_s14 + $0x60] sm:$0xff]  ;;  %v262_v24 = vld [vmem:[%s1070_s14 + $0x68] sm:$0xff]  ;;  %v372_v58 = vsub.s32 0, %v371_v57  ;;  %v378_v60 = vsub.s32 1, %v371_v57 }
  0x98   : > { %590 = vmatprep.subr.bf16.mxu0 %v589_v9  ;;  %v605_v22 = vpack.c.bf16 %v260_v21, %v259_v20  ;;  %v609_v25 = vpack.c.bf16 %v262_v24, %v261_v23  ;;  %v263_v26 = vld [vmem:[%s1070_s14 + $0x70] sm:$0xff]  ;;  %v264_v27 = vld [vmem:[%s1070_s14 + $0x78] sm:$0xff]  ;;  %v363_v59 = vld [vmem:[%s208_s11] sm:$0x3] }
  0x99   : > { %v613_v28 = vpack.c.bf16 %v264_v27, %v263_v26  ;;  %v266_v29 = vld [vmem:[#allocation2 + $0x8] sm:$0xff]  ;;  %v373_v61 = vrot.slane %v363_v59, %v372_v58  ;;  %v379_v1 = vrot.slane %v363_v59, %v378_v60 }
  0x9a   : > { %p524_p9 = scmp.ne.s32.totalorder %s1102_s25, 1 }
  0x9b   : > { %592 = vmatpush3.bf16.msra.mxu0 %v589_v9  ;;  %v392_v7 = vld [vmem:[#allocation3] sm:$0xff] (!%p524_p9)  ;;  %v393_v10 = vld [vmem:[#allocation3 + $0x8] sm:$0xff] (!%p524_p9) }
  0x9c   : > { %594 = vmatprep.subr.bf16.mxu0 %v593_v12 }
  0x9f   : > { %596 = vmatpush3.bf16.msra.mxu0 %v593_v12 }
  0xa0   : > { %598 = vmatprep.subr.bf16.mxu0 %v597_v16 }
  0xa3   : > { %600 = vmatpush3.bf16.msra.mxu0 %v597_v16 }
  0xa4   : > { %602 = vmatprep.subr.bf16.mxu0 %v601_v19 }
  0xa7   : > { %604 = vmatpush3.bf16.msra.mxu0 %v601_v19 }
  0xa8   : > { %606 = vmatprep.subr.bf16.mxu0 %v605_v22 }
  0xab   : > { %608 = vmatpush3.bf16.msra.mxu0 %v605_v22 }
  0xac   : > { %610 = vmatprep.subr.bf16.mxu0 %v609_v25 }
  0xaf   : > { %612 = vmatpush3.bf16.msra.mxu0 %v609_v25 }
  0xb0   : > { %614 = vmatprep.subr.bf16.mxu0 %v613_v28 }
  0xb3   : > { %616 = vmatpush3.bf16.msra.mxu0 %v613_v28 }
  0xb6   : > { %583 = vmatmul.mubr.f32.vlgmr.msra.gmra.mrb[0].mxu0 %v266_v29 }
 0x189   : > { %v584_v30 = vpop.f32.mrb[0].mxu0 }
 0x18a   : > { %v351_v31 = vmul.f32 %v584_v30, %v584_v30  ;;  %v333_v32 = vpop.f32.mrb[1].mxu0 }
 0x18b   : > { %v342_v33 = vadd.f32 %v584_v30, %v333_v32  ;;  %v350_v34 = vmul.f32 %v333_v32, %v333_v32 }
 0x18d   : > { %v343_v35 = vrot.slane %v342_v33, 4  ;;  %v352_v36 = vadd.f32 %v351_v31, %v350_v34 }
 0x18f   : > { %v344_v37 = vadd.f32 %v343_v35, %v342_v33  ;;  %v353_v38 = vrot.slane %v352_v36, 4 }
 0x191   : > { %v345_v39 = vrot.slane %v344_v37, 2  ;;  %v354_v40 = vadd.f32 %v353_v38, %v352_v36 }
 0x193   : > { %v346_v41 = vadd.f32 %v345_v39, %v344_v37  ;;  %v355_v42 = vrot.slane %v354_v40, 2 }
 0x195   : > { %v347_v43 = vrot.slane %v346_v41, 1  ;;  %v356_v44 = vadd.f32 %v355_v42, %v354_v40 }
 0x197   : > { %v348_v45 = vadd.f32 %v347_v43, %v346_v41  ;;  %v357_v46 = vrot.slane %v356_v44, 1 }
 0x199   : > { %v349_v47 = vmul.f32 0.0625, %v348_v45  ;;  %v358_v48 = vadd.f32 %v357_v46, %v356_v44 }
 0x19b   : > { %v359_v49 = vmul.f32 0.0625, %v358_v48  ;;  %v360_v50 = vmul.f32 %v349_v47, %v349_v47  ;;  %v364_v51 = vsub.f32 %v333_v32, %v349_v47  ;;  %v365_v52 = vsub.f32 %v584_v30, %v349_v47 }
 0x19d   : > { %v361_v53 = vsub.f32 %v359_v49, %v360_v50 }
 0x19f   : > { %v362_v54 = vmax.f32 %v361_v53, 0.0 }
 0x1a1   : > { %v366_v56 = vadd.f32 1e-05, %v362_v54 }
 0x1a3   : > { %684 = vrsqrt.f32 %v366_v56 }
 0x1ad   : > { %v685_v62 = vpop.eup %684 }
 0x1ae   : > { %v368_v63 = vmul.f32 %v685_v62, %v364_v51  ;;  %v369_v0 = vmul.f32 %v685_v62, %v365_v52  ;;  %389 = sbr.rel (%p524_p9) target bundleno = 447 (0x1bf), region = 56 }
 0x1b0   : > { %v374_v2 = vmul.f32 %v373_v61, %v368_v63  ;;  %v375_v3 = vmul.f32 %v373_v61, %v369_v0 }
 0x1b2   : > { %v380_v4 = vadd.f32 %v379_v1, %v374_v2  ;;  %v381_v5 = vadd.f32 %v379_v1, %v375_v3 }
 0x1b4   : > { %382 = vst [vmem:[#allocation2] sm:$0xff] %v380_v4  ;;  %383 = vst [vmem:[#allocation2 + $0x8] sm:$0xff] %v381_v5 }
 0x1bb   : > { %v390_v6 = vld [vmem:[#allocation2] sm:$0xff]  ;;  %v391_v8 = vld [vmem:[#allocation2 + $0x8] sm:$0xff] }
 0x1bc   : > { %v394_v9 = vadd.f32 %v392_v7, %v390_v6  ;;  %v395_v11 = vadd.f32 %v393_v10, %v391_v8 }
 0x1be   : > { %396 = vst [vmem:[#allocation2] sm:$0xff] %v394_v9  ;;  %397 = vst [vmem:[#allocation2 + $0x8] sm:$0xff] %v395_v11 }
 0x1bf PF: > { %s398_s17 = sadd.s32 2, %s1082_s18 }
 0x1c0   : > { %s399_s20 = sld [smem:[#allocation5 + %s398_s17]] }
 0x1c6   : > { %p525_p3 = scmp.ne.s32.totalorder %s399_s20, 1 }
 0x1c7   : > { %v404_v12 = vld [vmem:[#allocation2] sm:$0xff] (!%p525_p3)  ;;  %v405_v13 = vld [vmem:[#allocation2 + $0x8] sm:$0xff] (!%p525_p3) }
 0x1c8   : > { %403 = sbr.rel (%p525_p3) target bundleno = 463 (0x1cf), region = 60  ;;  %v406_v14 = vmax.f32 (!%p525_p3), %v404_v12, 0.0  ;;  %v407_v15 = vmax.f32 (!%p525_p3), %v405_v13, 0.0 }
 0x1ca   : > { %408 = vst [vmem:[#allocation2] sm:$0xff] (!%p525_p3), %v406_v14  ;;  %409 = vst [vmem:[#allocation2 + $0x8] sm:$0xff] (!%p525_p3), %v407_v15 }
 0x1cf PF: > { %p526_p7 = scmp.ne.s32.totalorder %s983_s9, 8 }
 0x1d1   : > { %413 = sbr.rel (%p526_p7) target bundleno = 472 (0x1d8), region = 64  ;;  %v414_v16 = vld [vmem:[#allocation2] sm:$0xff] (!%p526_p7)  ;;  %v415_v17 = vld [vmem:[#allocation2 + $0x8] sm:$0xff] (!%p526_p7) }
 0x1d2   : > { %416 = vst [vmem:[#allocation12] sm:$0xff] (!%p526_p7), %v414_v16  ;;  %417 = vst [vmem:[#allocation12 + $0x8] sm:$0xff] (!%p526_p7), %v415_v17 }
 0x1d8 PF: > { %p643_p4 = scmp.eq.s32.totalorder %s983_s9, 8  ;;  %s862_s21 = smov [#allocation12]  }
 0x1d9   : > { %s424_s19 = sshll.u32 %s862_s21, 4  ;;  %s425_s19 = int_to_ptr.vmem [resolvable:$true] %s424_s19 }
 0x1da   : > { %s784_s7 = scalar_lea.vmem %s425_s19, 256  ;;  %p791_p6 = scmp.lt.s32.totalorder %s425_s19, %s425_s19 }
 0x1db   : > { %p785_p10 = scmp.ne.s32.totalorder %s425_s19, %s784_s7  ;;  %p792_p8 = scmp.lt.s32.totalorder %s784_s7, %s784_s7 }
 0x1dd   : > { %p786_p1 = pnand %p785_p10, %p643_p4  ;;  %p793_p13 = por %p792_p8, %p791_p6 }
 0x1df   : > { %p787_p5 = pneg %p786_p1 }
 0x1e1   : > { %p794_p0 = pnand %p793_p13, %p787_p5 }
 0x1e3   : > { %797 = shalt.err (!%p794_p0)
}
 0x1e4   : > { %s798_s6 = scalar_lea.hbm %s1149_s4, 256 }
 0x1e5   : > { %p799_p12 = scmp.ne.s32.totalorder %s1149_s4, %s798_s6  ;;  %p804_p9 = scmp.lt.u32.totalorder %s798_s6, %s1149_s4 }
 0x1e7   : > { %p800_p11 = pnand %p799_p12, %p643_p4 }
 0x1e9   : > { %p801_p2 = pneg %p800_p11 }
 0x1eb   : > { %p806_p3 = pnand %p804_p9, %p801_p2 }
 0x1ed   : > { %809 = shalt.err (!%p806_p3)
}
 0x1ee   : > { %s863_s30 = smov 128   ;;  %s864_s12 = smov 8  }
 0x1ef   : > { %626 = dma.vmem_to_hbm [thread:$0]  (%p643_p4), %s425_s19, 256, %s1149_s4, [#allocation8], %s863_s30, %s863_s30, %s864_s12  }
 0x1f0   : > { %837 = dma.done.wait (%p643_p4), [#allocation8], 256  }
 0x1f1   : > { %839 = vsyncadd (%p643_p4), [#allocation8], 4294967040 }
 0x1f2 PF: > { %p20_p7 = scmp.ge.s32.totalorder %s923_s0, 11   ;;  %s1168_s25 = smov %s846_s26 }
 0x1f3   : > { %s1169_s26 = smov %s850_s27  ;;  %s1170_s27 = smov %s932_s5 }
 0x1f4   : > { %s1171_s28 = smov %s923_s0  ;;  %22 = sbr.rel (!%p20_p7) target bundleno = 17 (0x11), region = 105 }
 0x1fb   :  { %440 = vsyncpa [#allocation7], 1 }
 0x1fc   :  { %442 = vsyncpa [#allocation7 + $0x1], 1 }
 0x1fd   :  { %443 = vsyncpa [#allocation10], 1 }
 0x1fe   :  { %445 = vsyncpa [#allocation10 + $0x1], 1 }
 0x1ff   :  { %446 = vsyncpa [#allocation8], 1 }
 0x200   :  { %448 = vsyncpa [#allocation8 + $0x1], 1 }

</bundles_post_ra>
